<compile_context>
chip_gen: v6e
topology: v6e:2x2x1
jax: 0.10.0
libtpu: 0.0.40
codegen_flags: <defaults>
</compile_context>

<pallas_src>
import functools

import jax
import jax.numpy as jnp
from jax.experimental import pallas as pl
from jax.experimental.pallas import tpu as pltpu


# ----------------------------------------------------------------------------
# Fused kernel: per grid step t -> embedding gather + L LSTM cells + Linear.
# Recurrent state lives in a VMEM scratch slab across grid steps.
# ----------------------------------------------------------------------------
def _make_decoder_kernel(nr_layers, hidden_size):
    L, H = nr_layers, hidden_size

    def kernel(*refs):
        tok_ref = refs[0]                       # (1, B, 1) int32 (this step's tokens)
        emb_ref = refs[1]                       # (V, E)            resident
        layer_refs = refs[2:2 + 3 * L]          # per layer: wih_t, whh_t, bias
        fcw_ref = refs[2 + 3 * L]               # (H, O_pad)        resident
        fcb_ref = refs[3 + 3 * L]               # (1, O_pad)        resident
        state_in_ref = refs[4 + 3 * L]          # (B, 2*L*H)        resident
        pred_ref = refs[5 + 3 * L]              # (1, B, O_pad)     per step
        state_out_ref = refs[6 + 3 * L]         # (B, 2*L*H)        written at last step
        state_scr = refs[7 + 3 * L]             # (B, 2*L*H) VMEM scratch (persists)

        t = pl.program_id(0)
        V = emb_ref.shape[0]
        B = state_scr.shape[0]

        # Load the packed (h, c) state once at the first step.
        @pl.when(t == 0)
        def _():
            state_scr[...] = state_in_ref[...]

        # Embedding lookup: one-hot(idx) @ table on the MXU (table resident in
        # VMEM).  Indices clamped to [0, V) to match jnp.take semantics.
        toks = jnp.clip(tok_ref[0], 0, V - 1)                       # (B, 1) int32
        vocab_ids = jax.lax.broadcasted_iota(jnp.int32, (B, V), 1)
        one_hot = (vocab_ids == toks).astype(jnp.float32)
        x = jnp.dot(one_hot, emb_ref[...], preferred_element_type=jnp.float32)

        # nn.Dropout is identity in eval mode.
        new_h, new_c = [], []
        for l in range(L):
            wih_t_ref = layer_refs[3 * l + 0]
            whh_t_ref = layer_refs[3 * l + 1]
            b_ref = layer_refs[3 * l + 2]

            h_l = state_scr[:, l * H:(l + 1) * H]
            c_l = state_scr[:, (L + l) * H:(L + l + 1) * H]

            gates = (
                jnp.dot(x, wih_t_ref[...], preferred_element_type=jnp.float32)
                + jnp.dot(h_l, whh_t_ref[...],
                          preferred_element_type=jnp.float32)
                + b_ref[...]
            )
            # Full-width activations over the (B, 4H) vreg, then slice.
            sig = jax.nn.sigmoid(gates)
            tnh = jnp.tanh(gates)
            i_g = sig[:, 0 * H:1 * H]
            f_g = sig[:, 1 * H:2 * H]
            g_g = tnh[:, 2 * H:3 * H]
            o_g = sig[:, 3 * H:4 * H]

            c_new = f_g * c_l + i_g * g_g
            h_new = o_g * jnp.tanh(c_new)
            new_h.append(h_new)
            new_c.append(c_new)
            x = h_new

        # One lane-dense store of the whole packed state (B, 2*L*H).
        state_scr[...] = jnp.concatenate(new_h + new_c, axis=-1)

        # Lane-dense (padded) prediction block for this step.
        pred_ref[0] = (
            jnp.dot(x, fcw_ref[...], preferred_element_type=jnp.float32)
            + fcb_ref[...]
        )

        # Write the final state to HBM only once, at the last step.
        @pl.when(t == pl.num_programs(0) - 1)
        def _():
            state_out_ref[...] = state_scr[...]

    return kernel


# ----------------------------------------------------------------------------
# One-time parameter preparation (hoisted out of the per-step hot path).
# ----------------------------------------------------------------------------
def prepare_params(params):
    layers = []
    for wl in params["lstm"]:
        layers.append((
            jnp.asarray(wl["w_ih"], jnp.float32).T,                 # (in, 4H)
            jnp.asarray(wl["w_hh"], jnp.float32).T,                 # (H, 4H)
            (wl["b_ih"] + wl["b_hh"]).reshape(1, -1).astype(jnp.float32),
        ))
    fc_w = jnp.asarray(params["fc_w"], jnp.float32)                 # (O, H)
    fc_b = jnp.asarray(params["fc_b"], jnp.float32)                 # (O,)
    O, H = fc_w.shape
    O_pad = ((O + 127) // 128) * 128                                # lane-dense output
    fc_w_t = jnp.zeros((H, O_pad), jnp.float32).at[:, :O].set(fc_w.T)
    fc_b_p = jnp.zeros((1, O_pad), jnp.float32).at[:, :O].set(fc_b)
    return {
        "embedding": jnp.asarray(params["embedding"], jnp.float32),  # (V, E)
        "layers": layers,
        "fc_w_t": fc_w_t,                                            # (H, O_pad)
        "fc_b": fc_b_p,                                              # (1, O_pad)
    }


# ----------------------------------------------------------------------------
# State packing: (L,B,H)+(L,B,H) <-> single lane-dense (B, 2*L*H) slab.
# ----------------------------------------------------------------------------
def _pack_state(hidden, cell):
    L, B, H = hidden.shape
    return jnp.concatenate(
        [hidden.transpose(1, 0, 2).reshape(B, L * H),
         cell.transpose(1, 0, 2).reshape(B, L * H)], axis=-1)


def _unpack_state(state, L, H):
    B = state.shape[0]
    h = state[:, :L * H].reshape(B, L, H).transpose(1, 0, 2)
    c = state[:, L * H:].reshape(B, L, H).transpose(1, 0, 2)
    return h, c


# ----------------------------------------------------------------------------
# Multi-step decode: T sequential applications of Decoder.forward fused into
# ONE pallas_call (teacher-forced token sequence).
# ----------------------------------------------------------------------------
def decoder_decode(prepped, index_seq, hidden, cell, *, output_size):
    """index_seq: (T, B) int tokens; hidden, cell: (L, B, H).
       Returns (predictions (T, B, O), hidden (L, B, H), cell (L, B, H))."""
    T, B = index_seq.shape
    L, _, H = hidden.shape
    V, E = prepped["embedding"].shape
    O_pad = prepped["fc_w_t"].shape[-1]
    S = 2 * L * H
    nr_layers = len(prepped["layers"])

    tok3d = index_seq.reshape(T, B, 1).astype(jnp.int32)
    state_in = _pack_state(hidden, cell)

    flat_w = []
    in_specs = [
        pl.BlockSpec((1, B, 1), lambda t: (t, 0, 0)),     # tokens: new block per step
        pl.BlockSpec((V, E), lambda t: (0, 0)),           # embedding: resident
    ]
    for wih_t, whh_t, bias in prepped["layers"]:
        flat_w += [wih_t, whh_t, bias]
        in_specs += [
            pl.BlockSpec(wih_t.shape, lambda t: (0, 0)),  # resident
            pl.BlockSpec(whh_t.shape, lambda t: (0, 0)),  # resident
            pl.BlockSpec(bias.shape, lambda t: (0, 0)),   # resident
        ]
    in_specs += [
        pl.BlockSpec((H, O_pad), lambda t: (0, 0)),       # fc_w_t: resident
        pl.BlockSpec((1, O_pad), lambda t: (0, 0)),       # fc_b : resident
        pl.BlockSpec((B, S), lambda t: (0, 0)),           # packed state in: resident
    ]
    out_specs = [
        pl.BlockSpec((1, B, O_pad), lambda t: (t, 0, 0)), # preds: one block per step
        pl.BlockSpec((B, S), lambda t: (0, 0)),           # packed state out
    ]

    grid_spec = pltpu.PrefetchScalarGridSpec(
        num_scalar_prefetch=0,
        grid=(T,),
        in_specs=in_specs,
        out_specs=out_specs,
        scratch_shapes=[pltpu.VMEM((B, S), jnp.float32)],  # state carried across steps
    )

    preds_pad, state_out = pl.pallas_call(
        _make_decoder_kernel(nr_layers, H),
        grid_spec=grid_spec,
        out_shape=(
            jax.ShapeDtypeStruct((T, B, O_pad), jnp.float32),
            jax.ShapeDtypeStruct((B, S), jnp.float32),
        ),
        # In-place state update: packed state input aliases packed state output.
        input_output_aliases={4 + 3 * nr_layers: 1},
        compiler_params=pltpu.CompilerParams(
            dimension_semantics=("arbitrary",)),           # sequential recurrence
    )(tok3d, prepped["embedding"], *flat_w,
      prepped["fc_w_t"], prepped["fc_b"], state_in)

    preds = preds_pad[:, :, :output_size]                  # drop lane padding
    h_out, c_out = _unpack_state(state_out, L, H)
    return preds, h_out, c_out


# ----------------------------------------------------------------------------
# Single step == Decoder.forward(indexVector, hidden, cell)  (T == 1).
# ----------------------------------------------------------------------------
def decoder_forward(prepped, index_vector, hidden, cell, *, output_size):
    preds, h, c = decoder_decode(prepped, index_vector.reshape(1, -1),
                                 hidden, cell, output_size=output_size)
    return preds[0], h, c


# ----------------------------------------------------------------------------
# Pure-JAX reference (same math, no Pallas) for validation.
# ----------------------------------------------------------------------------
def decoder_forward_ref(params, index_vector, hidden, cell):
    x = jnp.take(params["embedding"], index_vector, axis=0)
    H = hidden.shape[-1]
    new_h, new_c = [], []
    for l, wl in enumerate(params["lstm"]):
        gates = (x @ wl["w_ih"].T + wl["b_ih"]
                 + hidden[l] @ wl["w_hh"].T + wl["b_hh"])
        i = jax.nn.sigmoid(gates[:, 0 * H:1 * H])
        f = jax.nn.sigmoid(gates[:, 1 * H:2 * H])
        g = jnp.tanh(gates[:, 2 * H:3 * H])
        o = jax.nn.sigmoid(gates[:, 3 * H:4 * H])
        c_l = f * cell[l] + i * g
        h_l = o * jnp.tanh(c_l)
        new_h.append(h_l)
        new_c.append(c_l)
        x = h_l
    preds = x @ params["fc_w"].T + params["fc_b"]
    return preds, jnp.stack(new_h), jnp.stack(new_c)


# ----------------------------------------------------------------------------
# Deterministic parameter initialization (PyTorch-like uniform(-k, k)).
# ----------------------------------------------------------------------------
def init_params(key, input_size, embedding_size, hidden_size, output_size,
                nr_layers):
    k_emb, k_lstm, k_fc = jax.random.split(key, 3)
    kH = 1.0 / jnp.sqrt(hidden_size)

    params = {
        "embedding": jax.random.normal(
            k_emb, (input_size, embedding_size), jnp.float32),
        "lstm": [],
    }
    lkeys = jax.random.split(k_lstm, nr_layers)
    for l in range(nr_layers):
        in_sz = embedding_size if l == 0 else hidden_size
        k1, k2, k3, k4 = jax.random.split(lkeys[l], 4)
        params["lstm"].append({
            "w_ih": jax.random.uniform(k1, (4 * hidden_size, in_sz),
                                       jnp.float32, -kH, kH),
            "w_hh": jax.random.uniform(k2, (4 * hidden_size, hidden_size),
                                       jnp.float32, -kH, kH),
            "b_ih": jax.random.uniform(k3, (4 * hidden_size,),
                                       jnp.float32, -kH, kH),
            "b_hh": jax.random.uniform(k4, (4 * hidden_size,),
                                       jnp.float32, -kH, kH),
        })
    kf1, kf2 = jax.random.split(k_fc)
    params["fc_w"] = jax.random.uniform(kf1, (output_size, hidden_size),
                                        jnp.float32, -kH, kH)
    params["fc_b"] = jax.random.uniform(kf2, (output_size,),
                                        jnp.float32, -kH, kH)
    return params


if __name__ == "__main__":
    # Small shapes consistent with the module's forward.
    input_size = 16       # vocab size
    embedding_size = 32
    hidden_size = 32
    output_size = 16
    nr_layers = 2
    batch = 8
    T = 4                 # decode steps fused into one kernel launch

    key = jax.random.PRNGKey(0)
    k_params, k_idx, k_h, k_c = jax.random.split(key, 4)

    params = init_params(k_params, input_size, embedding_size, hidden_size,
                         output_size, nr_layers)
    prepped = prepare_params(params)          # one-time weight prep (hoisted)

    index_seq = jax.random.randint(k_idx, (T, batch), 0, input_size,
                                   dtype=jnp.int32)
    hidden = jax.random.normal(k_h, (nr_layers, batch, hidden_size),
                               jnp.float32)
    cell = jax.random.normal(k_c, (nr_layers, batch, hidden_size),
                             jnp.float32)

    decode = jax.jit(decoder_decode, static_argnames=("output_size",))
    step = jax.jit(decoder_forward, static_argnames=("output_size",))

    # Fused T-step decode (one pallas_call).
    preds, h_out, c_out = decode(prepped, index_seq, hidden, cell,
                                 output_size=output_size)
    jax.block_until_ready((preds, h_out, c_out))

    # Reference: T sequential applications of the module forward.
    h_r, c_r = hidden, cell
    preds_r = []
    for t in range(T):
        p_t, h_r, c_r = decoder_forward_ref(params, index_seq[t], h_r, c_r)
        preds_r.append(p_t)
    preds_r = jnp.stack(preds_r)

    # Tolerance is loose enough to absorb possible bf16 MXU passes under
    # default matmul precision (Mosaic vs. XLA may use different f32-matmul
    # decompositions); structural/gate-order bugs would be O(1) errors.
    tol = dict(rtol=3e-2, atol=3e-2)
    assert jnp.allclose(preds, preds_r, **tol)
    assert jnp.allclose(h_out, h_r, **tol)
    assert jnp.allclose(c_out, c_r, **tol)

    # Single-step path (== Decoder.forward) as the T == 1 special case.
    p1, h1, c1 = step(prepped, index_seq[0], hidden, cell,
                      output_size=output_size)
    jax.block_until_ready((p1, h1, c1))
    p1_r, h1_r, c1_r = decoder_forward_ref(params, index_seq[0], hidden, cell)
    assert jnp.allclose(p1, p1_r, **tol)
    assert jnp.allclose(h1, h1_r, **tol)
    assert jnp.allclose(c1, c1_r, **tol)

    print("KERNEL_OK")
</pallas_src>

<mosaic_0001>
module attributes {stable_mosaic.version = 11 : i64} {
  func.func @kernel(%arg0: i32, %arg1: memref<1x8x1xi32, #tpu.memory_space<vmem>>, %arg2: memref<16x32xf32, #tpu.memory_space<vmem>>, %arg3: memref<32x128xf32, #tpu.memory_space<vmem>>, %arg4: memref<32x128xf32, #tpu.memory_space<vmem>>, %arg5: memref<1x128xf32, #tpu.memory_space<vmem>>, %arg6: memref<32x128xf32, #tpu.memory_space<vmem>>, %arg7: memref<32x128xf32, #tpu.memory_space<vmem>>, %arg8: memref<1x128xf32, #tpu.memory_space<vmem>>, %arg9: memref<32x128xf32, #tpu.memory_space<vmem>>, %arg10: memref<1x128xf32, #tpu.memory_space<vmem>>, %arg11: memref<8x128xf32, #tpu.memory_space<vmem>>, %arg12: memref<1x8x128xf32, #tpu.memory_space<vmem>>, %arg13: memref<8x128xf32, #tpu.memory_space<vmem>>, %arg14: memref<8x128xf32, #tpu.memory_space<vmem>>) attributes {dimension_semantics = [#tpu.dimension_semantics<arbitrary>], iteration_bounds = array<i64: 4>, scalar_prefetch = 0 : i64, scratch_operands = 1 : i64, tpu.core_type = #tpu.core_type<tc>, window_params = [{transform_indices = @transform_0, window_bounds = array<i64: 1, 8, 1>}, {pipeline_mode = #tpu.pipeline_mode<synchronous>, transform_indices = @transform_1, window_bounds = array<i64: 16, 32>}, {pipeline_mode = #tpu.pipeline_mode<synchronous>, transform_indices = @transform_2, window_bounds = array<i64: 32, 128>}, {pipeline_mode = #tpu.pipeline_mode<synchronous>, transform_indices = @transform_3, window_bounds = array<i64: 32, 128>}, {pipeline_mode = #tpu.pipeline_mode<synchronous>, transform_indices = @transform_4, window_bounds = array<i64: 1, 128>}, {pipeline_mode = #tpu.pipeline_mode<synchronous>, transform_indices = @transform_5, window_bounds = array<i64: 32, 128>}, {pipeline_mode = #tpu.pipeline_mode<synchronous>, transform_indices = @transform_6, window_bounds = array<i64: 32, 128>}, {pipeline_mode = #tpu.pipeline_mode<synchronous>, transform_indices = @transform_7, window_bounds = array<i64: 1, 128>}, {pipeline_mode = #tpu.pipeline_mode<synchronous>, transform_indices = @transform_8, window_bounds = array<i64: 32, 128>}, {pipeline_mode = #tpu.pipeline_mode<synchronous>, transform_indices = @transform_9, window_bounds = array<i64: 1, 128>}, {pipeline_mode = #tpu.pipeline_mode<synchronous>, transform_indices = @transform_10, window_bounds = array<i64: 8, 128>}, {transform_indices = @transform_11, window_bounds = array<i64: 1, 8, 128>}, {pipeline_mode = #tpu.pipeline_mode<synchronous>, transform_indices = @transform_12, window_bounds = array<i64: 8, 128>}]} {
    %c0_i32 = arith.constant 0 : i32
    %0 = arith.cmpi eq, %arg0, %c0_i32 : i32
    %1 = arith.extui %0 : i1 to i32
    %c0_i32_0 = arith.constant 0 : i32
    %2 = arith.cmpi ne, %1, %c0_i32_0 : i32
    scf.if %2 {
      %c0_40 = arith.constant 0 : index
      %c0_41 = arith.constant 0 : index
      %79 = vector.load %arg11[%c0_40, %c0_41] : memref<8x128xf32, #tpu.memory_space<vmem>>, vector<8x128xf32>
      %c0_42 = arith.constant 0 : index
      %c0_43 = arith.constant 0 : index
      %80 = vector.load %arg14[%c0_42, %c0_43] : memref<8x128xf32, #tpu.memory_space<vmem>>, vector<8x128xf32>
      tpu.vector_store %arg14[%c0_42, %c0_43], %79 {strides = array<i32>} : memref<8x128xf32, #tpu.memory_space<vmem>>, vector<8x128xf32>,
    } else {
    }
    %c0 = arith.constant 0 : index
    %c0_1 = arith.constant 0 : index
    %c0_2 = arith.constant 0 : index
    %3 = vector.load %arg1[%c0, %c0_1, %c0_2] : memref<1x8x1xi32, #tpu.memory_space<vmem>>, vector<1x8x1xi32>
    %4 = vector.shape_cast %3 : vector<1x8x1xi32> to vector<8x1xi32>
    %c0_i32_3 = arith.constant 0 : i32
    %c15_i32 = arith.constant 15 : i32
    %5 = vector.broadcast %c0_i32_3 : i32 to vector<8x1xi32>
    %6 = arith.maxsi %5, %4 : vector<8x1xi32>
    %7 = vector.broadcast %c15_i32 : i32 to vector<8x1xi32>
    %8 = arith.minsi %7, %6 : vector<8x1xi32>
    %9 = tpu.iota {dimensions = array<i32: 1>} : vector<8x16xi32>
    %10 = vector.broadcast %8 : vector<8x1xi32> to vector<8x16xi32>
    %11 = arith.cmpi eq, %9, %10 : vector<8x16xi32>
    %12 = arith.extui %11 : vector<8x16xi1> to vector<8x16xi32>
    %13 = arith.sitofp %12 : vector<8x16xi32> to vector<8x16xf32>
    %c0_4 = arith.constant 0 : index
    %c0_5 = arith.constant 0 : index
    %14 = vector.load %arg2[%c0_4, %c0_5] : memref<16x32xf32, #tpu.memory_space<vmem>>, vector<16x32xf32>
    %cst = arith.constant dense<0.000000e+00> : vector<8x32xf32>
    %15 = tpu.matmul %13, %14, %cst {dimension_numbers = #tpu.dot_dimension_numbers<[1], [0], [0], [1], [0, 0, 1, 1], [], []>} : vector<8x16xf32>, vector<16x32xf32>, vector<8x32xf32> -> vector<8x32xf32>
    %c0_6 = arith.constant 0 : index
    %c0_7 = arith.constant 0 : index
    %16 = vector.load %arg14[%c0_6, %c0_7] : memref<8x128xf32, #tpu.memory_space<vmem>>, vector<8x32xf32>
    %c0_8 = arith.constant 0 : index
    %c64 = arith.constant 64 : index
    %17 = vector.load %arg14[%c0_8, %c64] : memref<8x128xf32, #tpu.memory_space<vmem>>, vector<8x32xf32>
    %c0_9 = arith.constant 0 : index
    %c0_10 = arith.constant 0 : index
    %18 = vector.load %arg3[%c0_9, %c0_10] : memref<32x128xf32, #tpu.memory_space<vmem>>, vector<32x128xf32>
    %cst_11 = arith.constant dense<0.000000e+00> : vector<8x128xf32>
    %19 = tpu.matmul %15, %18, %cst_11 {dimension_numbers = #tpu.dot_dimension_numbers<[1], [0], [0], [1], [0, 0, 1, 1], [], []>} : vector<8x32xf32>, vector<32x128xf32>, vector<8x128xf32> -> vector<8x128xf32>
    %c0_12 = arith.constant 0 : index
    %c0_13 = arith.constant 0 : index
    %20 = vector.load %arg4[%c0_12, %c0_13] : memref<32x128xf32, #tpu.memory_space<vmem>>, vector<32x128xf32>
    %cst_14 = arith.constant dense<0.000000e+00> : vector<8x128xf32>
    %21 = tpu.matmul %16, %20, %cst_14 {dimension_numbers = #tpu.dot_dimension_numbers<[1], [0], [0], [1], [0, 0, 1, 1], [], []>} : vector<8x32xf32>, vector<32x128xf32>, vector<8x128xf32> -> vector<8x128xf32>
    %22 = arith.addf %19, %21 : vector<8x128xf32>
    %c0_15 = arith.constant 0 : index
    %c0_16 = arith.constant 0 : index
    %23 = vector.load %arg5[%c0_15, %c0_16] : memref<1x128xf32, #tpu.memory_space<vmem>>, vector<1x128xf32>
    %24 = vector.broadcast %23 : vector<1x128xf32> to vector<8x128xf32>
    %25 = arith.addf %22, %24 : vector<8x128xf32>
    %26 = arith.negf %25 : vector<8x128xf32>
    %27 = math.exp %26 : vector<8x128xf32>
    %cst_17 = arith.constant 1.000000e+00 : f32
    %28 = vector.broadcast %cst_17 : f32 to vector<8x128xf32>
    %29 = arith.addf %28, %27 : vector<8x128xf32>
    %30 = arith.divf %28, %29 : vector<8x128xf32>
    %31 = math.tanh %25 : vector<8x128xf32>
    %32 = vector.extract_strided_slice %30 {offsets = [0, 0], sizes = [8, 32], strides = [1, 1]} : vector<8x128xf32> to vector<8x32xf32>
    %33 = vector.extract_strided_slice %30 {offsets = [0, 32], sizes = [8, 32], strides = [1, 1]} : vector<8x128xf32> to vector<8x32xf32>
    %34 = vector.extract_strided_slice %31 {offsets = [0, 64], sizes = [8, 32], strides = [1, 1]} : vector<8x128xf32> to vector<8x32xf32>
    %35 = vector.extract_strided_slice %30 {offsets = [0, 96], sizes = [8, 32], strides = [1, 1]} : vector<8x128xf32> to vector<8x32xf32>
    %36 = arith.mulf %33, %17 : vector<8x32xf32>
    %37 = arith.mulf %32, %34 : vector<8x32xf32>
    %38 = arith.addf %36, %37 : vector<8x32xf32>
    %39 = math.tanh %38 : vector<8x32xf32>
    %40 = arith.mulf %35, %39 : vector<8x32xf32>
    %c0_18 = arith.constant 0 : index
    %c32 = arith.constant 32 : index
    %41 = vector.load %arg14[%c0_18, %c32] : memref<8x128xf32, #tpu.memory_space<vmem>>, vector<8x32xf32>
    %c0_19 = arith.constant 0 : index
    %c96 = arith.constant 96 : index
    %42 = vector.load %arg14[%c0_19, %c96] : memref<8x128xf32, #tpu.memory_space<vmem>>, vector<8x32xf32>
    %c0_20 = arith.constant 0 : index
    %c0_21 = arith.constant 0 : index
    %43 = vector.load %arg6[%c0_20, %c0_21] : memref<32x128xf32, #tpu.memory_space<vmem>>, vector<32x128xf32>
    %cst_22 = arith.constant dense<0.000000e+00> : vector<8x128xf32>
    %44 = tpu.matmul %40, %43, %cst_22 {dimension_numbers = #tpu.dot_dimension_numbers<[1], [0], [0], [1], [0, 0, 1, 1], [], []>} : vector<8x32xf32>, vector<32x128xf32>, vector<8x128xf32> -> vector<8x128xf32>
    %c0_23 = arith.constant 0 : index
    %c0_24 = arith.constant 0 : index
    %45 = vector.load %arg7[%c0_23, %c0_24] : memref<32x128xf32, #tpu.memory_space<vmem>>, vector<32x128xf32>
    %cst_25 = arith.constant dense<0.000000e+00> : vector<8x128xf32>
    %46 = tpu.matmul %41, %45, %cst_25 {dimension_numbers = #tpu.dot_dimension_numbers<[1], [0], [0], [1], [0, 0, 1, 1], [], []>} : vector<8x32xf32>, vector<32x128xf32>, vector<8x128xf32> -> vector<8x128xf32>
    %47 = arith.addf %44, %46 : vector<8x128xf32>
    %c0_26 = arith.constant 0 : index
    %c0_27 = arith.constant 0 : index
    %48 = vector.load %arg8[%c0_26, %c0_27] : memref<1x128xf32, #tpu.memory_space<vmem>>, vector<1x128xf32>
    %49 = vector.broadcast %48 : vector<1x128xf32> to vector<8x128xf32>
    %50 = arith.addf %47, %49 : vector<8x128xf32>
    %51 = arith.negf %50 : vector<8x128xf32>
    %52 = math.exp %51 : vector<8x128xf32>
    %cst_28 = arith.constant 1.000000e+00 : f32
    %53 = vector.broadcast %cst_28 : f32 to vector<8x128xf32>
    %54 = arith.addf %53, %52 : vector<8x128xf32>
    %55 = arith.divf %53, %54 : vector<8x128xf32>
    %56 = math.tanh %50 : vector<8x128xf32>
    %57 = vector.extract_strided_slice %55 {offsets = [0, 0], sizes = [8, 32], strides = [1, 1]} : vector<8x128xf32> to vector<8x32xf32>
    %58 = vector.extract_strided_slice %55 {offsets = [0, 32], sizes = [8, 32], strides = [1, 1]} : vector<8x128xf32> to vector<8x32xf32>
    %59 = vector.extract_strided_slice %56 {offsets = [0, 64], sizes = [8, 32], strides = [1, 1]} : vector<8x128xf32> to vector<8x32xf32>
    %60 = vector.extract_strided_slice %55 {offsets = [0, 96], sizes = [8, 32], strides = [1, 1]} : vector<8x128xf32> to vector<8x32xf32>
    %61 = arith.mulf %58, %42 : vector<8x32xf32>
    %62 = arith.mulf %57, %59 : vector<8x32xf32>
    %63 = arith.addf %61, %62 : vector<8x32xf32>
    %64 = math.tanh %63 : vector<8x32xf32>
    %65 = arith.mulf %60, %64 : vector<8x32xf32>
    %66 = tpu.concatenate %40, %65, %38, %63 in 1 : vector<8x32xf32>, vector<8x32xf32>, vector<8x32xf32>, vector<8x32xf32> -> vector<8x128xf32>
    %c0_29 = arith.constant 0 : index
    %c0_30 = arith.constant 0 : index
    %67 = vector.load %arg14[%c0_29, %c0_30] : memref<8x128xf32, #tpu.memory_space<vmem>>, vector<8x128xf32>
    tpu.vector_store %arg14[%c0_29, %c0_30], %66 {strides = array<i32>} : memref<8x128xf32, #tpu.memory_space<vmem>>, vector<8x128xf32>,
    %c0_31 = arith.constant 0 : index
    %c0_32 = arith.constant 0 : index
    %68 = vector.load %arg9[%c0_31, %c0_32] : memref<32x128xf32, #tpu.memory_space<vmem>>, vector<32x128xf32>
    %cst_33 = arith.constant dense<0.000000e+00> : vector<8x128xf32>
    %69 = tpu.matmul %65, %68, %cst_33 {dimension_numbers = #tpu.dot_dimension_numbers<[1], [0], [0], [1], [0, 0, 1, 1], [], []>} : vector<8x32xf32>, vector<32x128xf32>, vector<8x128xf32> -> vector<8x128xf32>
    %c0_34 = arith.constant 0 : index
    %c0_35 = arith.constant 0 : index
    %70 = vector.load %arg10[%c0_34, %c0_35] : memref<1x128xf32, #tpu.memory_space<vmem>>, vector<1x128xf32>
    %71 = vector.broadcast %70 : vector<1x128xf32> to vector<8x128xf32>
    %72 = arith.addf %69, %71 : vector<8x128xf32>
    %c0_36 = arith.constant 0 : index
    %c0_37 = arith.constant 0 : index
    %c0_38 = arith.constant 0 : index
    %73 = vector.load %arg12[%c0_36, %c0_37, %c0_38] : memref<1x8x128xf32, #tpu.memory_space<vmem>>, vector<1x8x128xf32>
    %74 = vector.shape_cast %73 : vector<1x8x128xf32> to vector<8x128xf32>
    %75 = vector.shape_cast %72 : vector<8x128xf32> to vector<1x8x128xf32>
    tpu.vector_store %arg12[%c0_36, %c0_37, %c0_38], %75 {strides = array<i32>} : memref<1x8x128xf32, #tpu.memory_space<vmem>>, vector<1x8x128xf32>,
    %c3_i32 = arith.constant 3 : i32
    %76 = arith.cmpi eq, %arg0, %c3_i32 : i32
    %77 = arith.extui %76 : i1 to i32
    %c0_i32_39 = arith.constant 0 : i32
    %78 = arith.cmpi ne, %77, %c0_i32_39 : i32
    scf.if %78 {
      %c0_40 = arith.constant 0 : index
      %c0_41 = arith.constant 0 : index
      %79 = vector.load %arg14[%c0_40, %c0_41] : memref<8x128xf32, #tpu.memory_space<vmem>>, vector<8x128xf32>
      %c0_42 = arith.constant 0 : index
      %c0_43 = arith.constant 0 : index
      %80 = vector.load %arg13[%c0_42, %c0_43] : memref<8x128xf32, #tpu.memory_space<vmem>>, vector<8x128xf32>
      tpu.vector_store %arg13[%c0_42, %c0_43], %79 {strides = array<i32>} : memref<8x128xf32, #tpu.memory_space<vmem>>, vector<8x128xf32>,
    } else {
    }
    return
  }
  func.func @transform_0(%arg0: i32) -> (i32, i32, i32) {
    %c0_i32 = arith.constant 0 : i32
    %c0_i32_0 = arith.constant 0 : i32
    %c0_i32_1 = arith.constant 0 : i32
    return %arg0, %c0_i32, %c0_i32_0 : i32, i32, i32
  }
  func.func @transform_1(%arg0: i32) -> (i32, i32) {
    %c0_i32 = arith.constant 0 : i32
    %c0_i32_0 = arith.constant 0 : i32
    %c0_i32_1 = arith.constant 0 : i32
    return %c0_i32, %c0_i32_0 : i32, i32
  }
  func.func @transform_2(%arg0: i32) -> (i32, i32) {
    %c0_i32 = arith.constant 0 : i32
    %c0_i32_0 = arith.constant 0 : i32
    %c0_i32_1 = arith.constant 0 : i32
    return %c0_i32, %c0_i32_0 : i32, i32
  }
  func.func @transform_3(%arg0: i32) -> (i32, i32) {
    %c0_i32 = arith.constant 0 : i32
    %c0_i32_0 = arith.constant 0 : i32
    %c0_i32_1 = arith.constant 0 : i32
    return %c0_i32, %c0_i32_0 : i32, i32
  }
  func.func @transform_4(%arg0: i32) -> (i32, i32) {
    %c0_i32 = arith.constant 0 : i32
    %c0_i32_0 = arith.constant 0 : i32
    %c0_i32_1 = arith.constant 0 : i32
    return %c0_i32, %c0_i32_0 : i32, i32
  }
  func.func @transform_5(%arg0: i32) -> (i32, i32) {
    %c0_i32 = arith.constant 0 : i32
    %c0_i32_0 = arith.constant 0 : i32
    %c0_i32_1 = arith.constant 0 : i32
    return %c0_i32, %c0_i32_0 : i32, i32
  }
  func.func @transform_6(%arg0: i32) -> (i32, i32) {
    %c0_i32 = arith.constant 0 : i32
    %c0_i32_0 = arith.constant 0 : i32
    %c0_i32_1 = arith.constant 0 : i32
    return %c0_i32, %c0_i32_0 : i32, i32
  }
  func.func @transform_7(%arg0: i32) -> (i32, i32) {
    %c0_i32 = arith.constant 0 : i32
    %c0_i32_0 = arith.constant 0 : i32
    %c0_i32_1 = arith.constant 0 : i32
    return %c0_i32, %c0_i32_0 : i32, i32
  }
  func.func @transform_8(%arg0: i32) -> (i32, i32) {
    %c0_i32 = arith.constant 0 : i32
    %c0_i32_0 = arith.constant 0 : i32
    %c0_i32_1 = arith.constant 0 : i32
    return %c0_i32, %c0_i32_0 : i32, i32
  }
  func.func @transform_9(%arg0: i32) -> (i32, i32) {
    %c0_i32 = arith.constant 0 : i32
    %c0_i32_0 = arith.constant 0 : i32
    %c0_i32_1 = arith.constant 0 : i32
    return %c0_i32, %c0_i32_0 : i32, i32
  }
  func.func @transform_10(%arg0: i32) -> (i32, i32) {
    %c0_i32 = arith.constant 0 : i32
    %c0_i32_0 = arith.constant 0 : i32
    %c0_i32_1 = arith.constant 0 : i32
    return %c0_i32, %c0_i32_0 : i32, i32
  }
  func.func @transform_11(%arg0: i32) -> (i32, i32, i32) {
    %c0_i32 = arith.constant 0 : i32
    %c0_i32_0 = arith.constant 0 : i32
    %c0_i32_1 = arith.constant 0 : i32
    return %arg0, %c0_i32, %c0_i32_0 : i32, i32, i32
  }
  func.func @transform_12(%arg0: i32) -> (i32, i32) {
    %c0_i32 = arith.constant 0 : i32
    %c0_i32_0 = arith.constant 0 : i32
    %c0_i32_1 = arith.constant 0 : i32
    return %c0_i32, %c0_i32_0 : i32, i32
  }
}

</mosaic_0001>

<bundles_post_ra>
// kernel: decoder_decode.1
= control target key start
LH: loop header
LB: loop body
LE: loop exit
PB: predicated region body
PF: predicated region fallthrough
CT: control target
= control target key end

     0   :  { %s1711_s0 = inlined_call_operand.vmem [shape: s32[4,8,1], index: 0, kind: input, shape index: {}]   ;;  %s1712_s1 = inlined_call_operand.hbm [shape: f32[16,32], index: 1, kind: input, shape index: {}]   ;;  %s1713_s2 = inlined_call_operand.vmem [shape: f32[32,128], index: 2, kind: input, shape index: {}]   ;;  %s1714_s3 = inlined_call_operand.vmem [shape: f32[32,128], index: 3, kind: input, shape index: {}]   ;;  %s1715_s4 = inlined_call_operand.vmem [shape: f32[1,128], index: 4, kind: input, shape index: {}]   ;;  %s1716_s5 = inlined_call_operand.vmem [shape: f32[32,128], index: 5, kind: input, shape index: {}]   ;;  %s1717_s6 = inlined_call_operand.vmem [shape: f32[32,128], index: 6, kind: input, shape index: {}]   ;;  %s1718_s7 = inlined_call_operand.vmem [shape: f32[1,128], index: 7, kind: input, shape index: {}]   ;;  %s1719_s8 = inlined_call_operand.vmem [shape: f32[32,128], index: 8, kind: input, shape index: {}]   ;;  %s1720_s9 = inlined_call_operand.vmem [shape: f32[1,128], index: 9, kind: input, shape index: {}]   ;;  %s1721_s10 = inlined_call_operand.vmem [shape: f32[8,128], index: 10, kind: input, shape index: {}, may-alias: {10,12}]   ;;  %s1722_s11 = inlined_call_operand.hbm [shape: f32[4,8,128], index: 11, kind: output, shape index: {0}]   ;;  %s1723_s12 = inlined_call_operand.vmem [shape: f32[8,128], index: 12, kind: output, shape index: {1}, may-alias: {10,12}]  }
   0x1   :  { %1729 = sst [smem:[#allocation9_spill]] %s1711_s0 }
   0x2   :  { %1730 = sst [smem:[#allocation10_spill]] %s1712_s1 }
   0x3   :  { %1731 = sst [smem:[#allocation11_spill]] %s1713_s2 }
   0x4   :  { %1732 = sst [smem:[#allocation12_spill]] %s1714_s3 }
   0x5   :  { %18 = vsyncpa [#allocation4], 0 }
   0x6   :  { %19 = vsyncpa [#allocation5], 0 }
   0x7   :  { %21 = vsyncpa [#allocation5 + $0x1], 0  ;;  %s1458_s21 = smov 0   ;;  %s1460_s22 = smov 0  }
   0x8   :  { %s1462_s23 = smov 0   ;;  %s1464_s24 = smov 0  }
   0x9 LB: > { %s1479_s25 = sadd.s32 4294967295, %s1381_s24   ;;  %s1100_s26 = sadd.s32 4294967294, %s1381_s24   ;;  %s1381_s24 = sphi %s1464_s24, %s1750_s24   ;;  %s1377_s23 = sphi %s1462_s23, %s1749_s23   ;;  %s1373_s22 = sphi %s1460_s22, %s1748_s22   ;;  %s1369_s21 = sphi %s1458_s21, %s1747_s21  }
   0xa   : > { %s1483_s27 = sadd.s32 1, %s1381_s24   ;;  %s270_s28 = sadd.s32 1, %s1377_s23 }
   0xb   : > { %s267_s29 = ssub.s32 %s1381_s24, %s1483_s27  ;;  %p280_p0 = scmp.ne.s32.totalorder %s1377_s23, %s1373_s22 }
   0xc   : > { %p268_p1 = scmp.eq.s32.totalorder %s267_s29, 0  ;;  %p281_p2 = scmp.eq.s32.totalorder %s1479_s25, 3 }
   0xd   : > { %p286_p3 = scmp.ne.s32.totalorder %s1373_s22, %s1369_s21  ;;  %p287_p4 = scmp.eq.s32.totalorder %s1100_s26, 3 }
   0xe   : > { %s1494_s30 = scalar_select %p268_p1, %s1377_s23, %s270_s28  }
   0xf   : > { %p1496_p5 = por %p281_p2, %p280_p0  ;;  %p1500_p6 = por %p287_p4, %p286_p3 }
  0x10   : > { %p1101_p7 = scmp.ge.s32.totalorder %s1381_s24, 1  ;;  %p315_p8 = scmp.lt.s32.totalorder %s1381_s24, 5 }
  0x11   : > { %s1734_s14 = scalar_select %p1500_p6, 1, 0 }
  0x12   : > { %p1230_p10 = scmp.eq.s32.totalorder %s1479_s25, 0  ;;  %p1508_p11 = pnand %p1101_p7, %p315_p8 }
  0x13   : > { %s1383_s16 = smov [#allocation3]  }
  0x14   : > { %s327_s17 = sshll.u32 %s1383_s16, 4  ;;  %p1222_p12 = pneg %p1508_p11  ;;  %s328_s17 = int_to_ptr.vmem [resolvable:$true] %s327_s17 }
  0x15   : > { %s1302_s18 = scalar_lea.vmem %s328_s17, 256  ;;  %p1310_p4 = scmp.lt.s32.totalorder %s328_s17, %s328_s17 }
  0x16   : > { %p1223_p13 = pnand %p1230_p10, %p1222_p12  ;;  %p1303_p1 = scmp.ne.s32.totalorder %s328_s17, %s1302_s18 }
  0x17   : > { %p1311_p9 = scmp.lt.s32.totalorder %s1302_s18, %s1302_s18 }
  0x18   : > { %p1293_p0 = pneg %p1223_p13 }
  0x19   : > { %p1312_p6 = por %p1311_p9, %p1310_p4 }
  0x1a   : > { %p1305_p2 = pnand %p1303_p1, %p1293_p0 }
  0x1c   : > { %p1306_p3 = pneg %p1305_p2 }
  0x1e   : > { %p1313_p7 = pnand %p1312_p6, %p1306_p3 }
  0x20   : > { %1316 = shalt.err (!%p1313_p7)
}
  0x21   : > { %s1384_s19 = smov 128   ;;  %s1385_s20 = smov 8  }
  0x22   : > { %s1736_s1 = sld [smem:[#allocation10_spill]] }
  0x24   : > { %377 = sbr.rel (%p1508_p11) target bundleno = 1983 (0x7bf), region = 64 }
  0x28   : > { %1225 = dma.hbm_to_vmem [thread:$0]  (!%p1223_p13), %s1736_s1, 256, %s328_s17, [#allocation4], %s1384_s19, %s1384_s19, %s1385_s20  }
  0x29   : > { %1360 = dma.done.wait (%p1230_p10), [#allocation4], 256  }
  0x2a   : > { %1362 = vsyncadd (%p1230_p10), [#allocation4], 4294967040  ;;  %s1724_s29 = sand.u32 1, %s1373_s22   ;;  %p418_p6 = scmp.lt.s32.totalorder %s1479_s25, 3 }
  0x2b   : > { %s1529_s16 = sshll.u32 %s1724_s29, 3  ;;  %s1737_s0 = sld [smem:[#allocation9_spill]] }
  0x2c   : > { %s419_s17 = scalar_select %p418_p6, %s1479_s25, 3 }
  0x2d   : > { %p1738_p8 = scmp.ne.s32.totalorder %s1479_s25, 0 }
  0x2e   : > { %s1107_s18 = sshll.u32 %s419_s17, 3 }
  0x2f   : > { %425 = sbr.rel (%p1738_p8) target bundleno = 54 (0x36), region = 72 }
  0x31   : > { %s421_s20 = scalar_lea.vmem %s1737_s0, %s1107_s18 }
  0x34   : > { %v426_v0 = vld [vmem:[%s1721_s10] sm:$0xff] }
  0x35   : > { %427 = vst [vmem:[#allocation2] sm:$0xff] %v426_v0 }
  0x36 PF: > { %v428_v1 = vld [vmem:[%s421_s20] sm:$0xff]  ;;  %v442_v2 = vld [vmem:[#allocation3 + $0x8] sm:$0xff]  ;;  %v1386_v3 = vmov 0   ;;  %v1387_v4 = vmov 0.0   ;;  %v441_v5 = vld [vmem:[#allocation3] sm:$0xff]  ;;  %vm1388_vm1 = vmmov 0   ;;  %v433_v13 = vlaneseq }
  0x37   : > { %1274 = vset.pattern.permute.xlu0 %v1386_v3  ;;  %vm429_vm0 = vcmp.gt.s32.totalorder %v428_v1, 0  ;;  %1154 = vmatprep.subr.mxu0 %v1387_v4  ;;  %s1739_s3 = sld [smem:[#allocation12_spill]]  ;;  %vm526_vm3 = vcmask 261120   ;;  %vm443_vm4 = vcmask 130048   ;;  %s1389_s18 = smov 96   ;;  %v715_v30 = vld [vmem:[%s1717_s6 + $0x18] sm:$0xff] }
  0x38   : > { %v430_v6 = vsel %vm429_vm0, %v428_v1, 0  ;;  %1155 = vmatpush3.msra.mxu0 %v442_v2  ;;  %1158 = vmatprep.mubr.msk.f32.mxu0 %vm1388_vm1, %v1387_v4  ;;  %v434_v14 = vand.u32 127, %v433_v13  ;;  %s1740_s2 = sld [smem:[#allocation11_spill]]  ;;  %v1113_v26 = vld [vmem:[%s1715_s4] ss:$0 sm:$0xff]  ;;  %v714_v31 = vld [vmem:[%s1717_s6 + $0x10] sm:$0xff] }
  0x39   : > { %vm431_vm2 = vcmp.lt.s32.totalorder %v430_v6, 15  ;;  %1156 = vmatprep.subr.mxu0 %v1387_v4  ;;  %1161 = vmatprep.subr.mxu1 %v1387_v4  ;;  %v713_v32 = vld [vmem:[%s1717_s6 + $0x8] sm:$0xff]  ;;  %v712_v33 = vld [vmem:[%s1717_s6] sm:$0xff]  ;;  %s1727_s29 = smov 64   ;;  %s1725_s20 = smov 32   ;;  %v711_v46 = vld [vmem:[%s1716_s5 + $0x18] sm:$0xff] }
  0x3a   : > { %v432_v9 = vsel %vm431_vm2, %v430_v6, 15  ;;  %1157 = vmatpush3.msra.mxu0 %v441_v5  ;;  %1169 = vmatprep.mubr.msk.f32.mxu1 %vm1388_vm1, %v1387_v4  ;;  %v710_v47 = vld [vmem:[%s1716_s5 + $0x10] sm:$0xff]  ;;  %v709_v49 = vld [vmem:[%s1716_s5 + $0x8] sm:$0xff]  ;;  %v708_v50 = vld [vmem:[%s1716_s5] sm:$0xff]  ;;  %s1741_s28 = smov 32   ;;  %s1742_s1 = smov 64  }
  0x3b   : > { %436 = vperm.xlu0 %1274, %v432_v9   ;;  %1172 = vmatprep.subr.mxu0 %v1387_v4  ;;  %v1117_v56 = vld [vmem:[%s1718_s7] ss:$0 sm:$0xff]  ;;  %v919_v9 = vld [vmem:[%s1719_s8 + $0x10] sm:$0xff]  ;;  %vm912_vm6 = vcmask 523264   ;;  %vm914_vm7 = vcmask 785408   ;;  %p1121_p9 = scmp.ne.s32.totalorder %s1479_s25, 3 }
  0x3c   : > { %v1563_v12 = vld [vmem:[#allocation2] sm:$0xff] }
  0x3d   : > { %v525_v7 = vld [vmem:[%s1739_s3 + $0x18] sm:$0xff]  ;;  %v524_v8 = vld [vmem:[%s1739_s3 + $0x10] sm:$0xff]  ;;  %v523_v10 = vld [vmem:[%s1739_s3 + $0x8] sm:$0xff]  ;;  %688 = vrot.lane.b32.xlu1 %v1563_v12, %s1389_s18 }
  0x3e   : > { %1162 = vmatpush3.msra.mxu1 %v525_v7  ;;  %v522_v11 = vld [vmem:[%s1739_s3] sm:$0xff]  ;;  %v521_v16 = vld [vmem:[%s1740_s2 + $0x18] sm:$0xff]  ;;  %v520_v18 = vld [vmem:[%s1740_s2 + $0x10] sm:$0xff] }
  0x3f   : > { %1163 = vmatprep.subr.mxu1 %v1387_v4  ;;  %v519_v19 = vld [vmem:[%s1740_s2 + $0x8] sm:$0xff]  ;;  %v518_v20 = vld [vmem:[%s1740_s2] sm:$0xff] }
  0x40   : > { %1164 = vmatpush3.msra.mxu1 %v524_v8  ;;  %v920_v8 = vld [vmem:[%s1719_s8 + $0x18] sm:$0xff] }
  0x41   : > { %1165 = vmatprep.subr.mxu1 %v1387_v4 }
  0x42   : > { %1166 = vmatpush3.msra.mxu1 %v523_v10  ;;  %v918_v10 = vld [vmem:[%s1719_s8 + $0x8] sm:$0xff] }
  0x43   : > { %1167 = vmatprep.subr.mxu1 %v1387_v4 }
  0x44   : > { %1168 = vmatpush3.msra.mxu1 %v522_v11  ;;  %v917_v11 = vld [vmem:[%s1719_s8] sm:$0xff] }
  0x45   : > { %1170 = vmatmul.mubr.msk.f32.vlgmr.msra.gmra.mxu1 %vm526_vm3, %v1563_v12  ;;  %1183 = vmatprep.subr.mxu1 %v1387_v4 }
  0x46   : > { %1191 = vmatprep.mubr.msk.f32.mxu1 %vm1388_vm1, %v1387_v4  ;;  %1184 = vmatpush3.msra.mxu1 %v715_v30 }
  0x47   : > { %1185 = vmatprep.subr.mxu1 %v1387_v4 }
  0x48   : > { %1186 = vmatpush3.msra.mxu1 %v714_v31 }
  0x49   : > { %1187 = vmatprep.subr.mxu1 %v1387_v4 }
  0x4a   : > { %1188 = vmatpush3.msra.mxu1 %v713_v32 }
  0x4b   : > { %1189 = vmatprep.subr.mxu1 %v1387_v4 }
  0x4c   : > { %1190 = vmatpush3.msra.mxu1 %v712_v33 }
  0x4d   : > { %1205 = vmatprep.subr.mxu1 %v1387_v4 }
  0xaf   : > { %v689_v34 = vpop.permute.xlu1 %688 }
  0xb0   : > { %1192 = vmatmul.mubr.msk.f32.vlgmr.msra.gmra.mxu1 %vm526_vm3, %v689_v34 }
  0xb1   : > { %1213 = vmatprep.mubr.msk.f32.mxu1 %vm1388_vm1, %v1387_v4  ;;  %1206 = vmatpush3.msra.mxu1 %v920_v8 }
  0xb2   : > { %1207 = vmatprep.subr.mxu1 %v1387_v4 }
  0xb3   : > { %1208 = vmatpush3.msra.mxu1 %v919_v9 }
  0xb4   : > { %1209 = vmatprep.subr.mxu1 %v1387_v4 }
  0xb5   : > { %1210 = vmatpush3.msra.mxu1 %v918_v10 }
  0xb6   : > { %v437_v15 = vpop.permute.xlu0 %436  ;;  %1211 = vmatprep.subr.mxu1 %v1387_v4 }
  0xb7   : > { %vm438_vm5 = vcmp.eq.s32.totalorder %v434_v14, %v437_v15  ;;  %1212 = vmatpush3.msra.mxu1 %v917_v11 }
  0xb8   : > { %v1109_v17 = vsel %vm438_vm5, 1.0, %v1387_v4 }
  0xb9   : > { %1159 = vmatmul.mubr.msk.f32.vlgmr.msra.gmra.mxu0 %vm443_vm4, %v1109_v17 }
  0xba   : > { %1173 = vmatpush3.msra.mxu0 %v521_v16  ;;  %1180 = vmatprep.mubr.msk.f32.mxu0 %vm1388_vm1, %v1387_v4 }
  0xbb   : > { %1174 = vmatprep.subr.mxu0 %v1387_v4 }
  0xbc   : > { %1175 = vmatpush3.msra.mxu0 %v520_v18 }
  0xbd   : > { %1176 = vmatprep.subr.mxu0 %v1387_v4 }
  0xbe   : > { %1177 = vmatpush3.msra.mxu0 %v519_v19 }
  0xbf   : > { %1178 = vmatprep.subr.mxu0 %v1387_v4 }
  0xc0   : > { %1179 = vmatpush3.msra.mxu0 %v518_v20 }
  0xc1   : > { %1194 = vmatprep.subr.mxu0 %v1387_v4 }
 0x105   : > { %v596_v21 = vpop.f32.mrf.mxu1 }
 0x107   : > { %v1171_v22 = vpop.f32.mrf.mxu1 }
 0x170   : > { %v784_v45 = vpop.f32.mrf.mxu1 }
 0x172   : > { %v1193_v48 = vpop.f32.mrf.mxu1 }
 0x179   : > { %v513_v23 = vpop.f32.mrf.mxu0 }
 0x17a   : > { %1181 = vmatmul.mubr.msk.f32.vlgmr.msra.gmra.mxu0 %vm526_vm3, %v513_v23 }
 0x17b   : > { %v1160_v24 = vpop.f32.mrf.mxu0  ;;  %1202 = vmatprep.mubr.msk.f32.mxu0 %vm1388_vm1, %v1387_v4  ;;  %1195 = vmatpush3.msra.mxu0 %v711_v46 }
 0x17c   : > { %1196 = vmatprep.subr.mxu0 %v1387_v4 }
 0x17d   : > { %1197 = vmatpush3.msra.mxu0 %v710_v47 }
 0x17e   : > { %1198 = vmatprep.subr.mxu0 %v1387_v4 }
 0x17f   : > { %1199 = vmatpush3.msra.mxu0 %v709_v49 }
 0x180   : > { %1200 = vmatprep.subr.mxu0 %v1387_v4 }
 0x181   : > { %1201 = vmatpush3.msra.mxu0 %v708_v50 }
 0x23a   : > { %v669_v25 = vpop.f32.mrf.mxu0 }
 0x23b   : > { %v670_v27 = vadd.f32 %v669_v25, %v596_v21  ;;  %v1119_v21 = vld [vmem:[%s1720_s9] ss:$0 sm:$0xff] }
 0x23c   : > { %v1182_v28 = vpop.f32.mrf.mxu0 }
 0x23d   : > { %v680_v29 = vadd.f32 %v1113_v26, %v670_v27 }
 0x23f   : > { %1275 = vtanh.f32 %v680_v29  ;;  %v1114_v36 = vmul.f32 -1.442695, %v680_v29 }
 0x241   : > { %1277 = vpow2.f32 %v1114_v36 }
 0x24c   : > { %v1276_v35 = vpop.eup %1275 }
 0x24d   : > { %693 = vrot.lane.b32.xlu0 %v1276_v35, %s1727_s29 }
 0x24e   : > { %v1278_v37 = vpop.eup %1277 }
 0x24f   : > { %v684_v38 = vadd.f32 1.0, %v1278_v37 }
 0x251   : > { %1279 = vrcp.f32 %v684_v38 }
 0x25e   : > { %v1280_v39 = vpop.eup %1279 }
 0x25f   : > { %v691_v42 = vmul.f32 %v1280_v39, %v689_v34 }
 0x2bf   : > { %v694_v40 = vpop.permute.xlu0 %693 }
 0x2c0   : > { %v696_v41 = vmul.f32 %v1280_v39, %v694_v40 }
 0x2c2   : > { %698 = vrot.lane.b32.xlu1 %v696_v41, %s1725_s20 }
 0x334   : > { %v699_v43 = vpop.permute.xlu1 %698 }
 0x335   : > { %v701_v44 = vadd.f32 %v699_v43, %v691_v42 }
 0x337   : > { %1281 = vtanh.f32 %v701_v44 }
 0x344   : > { %v1282_v51 = vpop.eup %1281 }
 0x345   : > { %704 = vrot.lane.b32.xlu0 %v1282_v51, %s1727_s29 }
 0x3b7   : > { %v705_v52 = vpop.permute.xlu0 %704 }
 0x3b8   : > { %v707_v53 = vmul.f32 %v1280_v39, %v705_v52 }
 0x3ba   : > { %789 = vrot.lane.b32.xlu1 %v707_v53, %s1741_s28 }
 0x3be   : > { %878 = vrot.lane.b32.xlu1 %v1563_v12, %s1727_s29 }
 0x42c   : > { %v790_v54 = vpop.permute.xlu1 %789 }
 0x42d   : > { %1203 = vmatmul.mubr.msk.f32.vlgmr.msra.gmra.mxu0 %vm526_vm3, %v790_v54 }
 0x430   : > { %v879_v3 = vpop.permute.xlu1 %878 }
 0x4ed   : > { %v859_v55 = vpop.f32.mrf.mxu0 }
 0x4ee   : > { %v860_v57 = vadd.f32 %v859_v55, %v784_v45 }
 0x4ef   : > { %v1204_v58 = vpop.f32.mrf.mxu0 }
 0x4f0   : > { %v870_v59 = vadd.f32 %v1117_v56, %v860_v57 }
 0x4f2   : > { %1283 = vtanh.f32 %v870_v59  ;;  %v1118_v61 = vmul.f32 -1.442695, %v870_v59 }
 0x4f4   : > { %1285 = vpow2.f32 %v1118_v61 }
 0x4ff   : > { %v1284_v60 = vpop.eup %1283 }
 0x500   : > { %883 = vrot.lane.b32.xlu0 %v1284_v60, %s1727_s29 }
 0x501   : > { %v1286_v62 = vpop.eup %1285 }
 0x502   : > { %v874_v63 = vadd.f32 1.0, %v1286_v62 }
 0x504   : > { %1287 = vrcp.f32 %v874_v63 }
 0x511   : > { %v1288_v0 = vpop.eup %1287 }
 0x512   : > { %v881_v5 = vmul.f32 %v1288_v0, %v879_v3 }
 0x572   : > { %v884_v1 = vpop.permute.xlu0 %883 }
 0x573   : > { %v886_v2 = vmul.f32 %v1288_v0, %v884_v1 }
 0x575   : > { %888 = vrot.lane.b32.xlu0 %v886_v2, %s1741_s28 }
 0x5e7   : > { %v889_v6 = vpop.permute.xlu0 %888 }
 0x5e8   : > { %v891_v7 = vadd.f32 %v889_v6, %v881_v5 }
 0x5ea   : > { %1289 = vtanh.f32 %v891_v7 }
 0x5f7   : > { %v1290_v12 = vpop.eup %1289 }
 0x5f8   : > { %894 = vrot.lane.b32.xlu1 %v1290_v12, %s1742_s1 }
 0x66a   : > { %v895_v13 = vpop.permute.xlu1 %894 }
 0x66b   : > { %v897_v14 = vmul.f32 %v1288_v0, %v895_v13 }
 0x66d   : > { %900 = vrot.lane.b32.xlu1 %v897_v14, %s1742_s1  ;;  %928 = vrot.lane.b32.xlu0 %v897_v14, %s1741_s28 }
 0x671   : > { %908 = vrot.lane.b32.xlu1 %v891_v7, %s1742_s1  ;;  %904 = vrot.lane.b32.xlu0 %v701_v44, %s1741_s28  ;;  %s1743_s28 = scalar_lea.vmem [#allocation6], %s1529_s16 }
 0x6df   : > { %v901_v15 = vpop.permute.xlu1 %900  ;;  %v929_v16 = vpop.permute.xlu0 %928 }
 0x6e0   : > { %1214 = vmatmul.mubr.msk.f32.vlgmr.msra.gmra.mxu1 %vm526_vm3, %v929_v16  ;;  %v911_v4 = vsel %vm526_vm3, %v790_v54, %v901_v15 }
 0x6e3   : > { %v909_v17 = vpop.permute.xlu1 %908  ;;  %v905_v18 = vpop.permute.xlu0 %904 }
 0x6e4   : > { %v913_v19 = vsel %vm912_vm6, %v911_v4, %v905_v18 }
 0x6e5   : > { %v915_v20 = vsel %vm914_vm7, %v913_v19, %v909_v17 }
 0x6e6   : > { %916 = vst [vmem:[#allocation2] sm:$0xff] %v915_v20 }
 0x79f   : > { %1006 = sbr.rel (%p1121_p9) target bundleno = 1958 (0x7a6), region = 76 }
 0x7a0   : > { %v998_v22 = vpop.f32.mrf.mxu1 }
 0x7a1   : > { %v999_v23 = vadd.f32 %v1119_v21, %v998_v22 }
 0x7a2   : > { %v1215_v24 = vpop.f32.mrf.mxu1 }
 0x7a3   : > { %1002 = vst [vmem:[%s1743_s28] sm:$0xff] %v999_v23 }
 0x7a4   : > { %v1007_v25 = vld [vmem:[#allocation2] sm:$0xff] }
 0x7a5   : > { %1008 = vst [vmem:[%s1723_s12] sm:$0xff] %v1007_v25 }
 0x7a6 PF: > { %s1123_s19 = sshll.u32 %s1479_s25, 7  ;;  %s1744_s29 = scalar_lea.vmem [#allocation6], %s1529_s16 }
 0x7a7   : > { %s1021_s1 = scalar_lea.hbm %s1722_s11, %s1123_s19  ;;  %s1023_s17 = sshll.u32 %s1744_s29, 4  ;;  %s1024_s17 = int_to_ptr.vmem [resolvable:$true] %s1023_s17 }
 0x7a8   : > { %s1745_s28 = sand.u32 1, %s1373_s22   ;;  %s1317_s2 = scalar_lea.vmem %s1024_s17, 128 }
 0x7a9   : > { %s1010_s0 = scalar_lea.sflag [#allocation5], %s1745_s28  ;;  %p1318_p10 = scmp.ne.s32.totalorder %s1024_s17, %s1317_s2 }
 0x7aa   : > { %s1392_s18 = smov [#allocation6]  }
 0x7ab   : > { %p1319_p11 = pnand %p1318_p10, %p1496_p5  ;;  %s1321_s15 = sshll.u32 %s1392_s18, 4  ;;  %s1322_s15 = int_to_ptr.vmem [resolvable:$false] %s1321_s15 }
 0x7ac   : > { %s1323_s3 = scalar_lea.vmem %s1322_s15, 256  ;;  %p1324_p13 = scmp.lt.s32.totalorder %s1024_s17, %s1322_s15 }
 0x7ad   : > { %p1320_p12 = pneg %p1319_p11  ;;  %p1325_p0 = scmp.lt.s32.totalorder %s1323_s3, %s1317_s2 }
 0x7af   : > { %p1326_p1 = por %p1325_p0, %p1324_p13 }
 0x7b1   : > { %p1327_p2 = pnand %p1326_p1, %p1320_p12 }
 0x7b3   : > { %1330 = shalt.err (!%p1327_p2)
}
 0x7b4   : > { %s1331_s25 = scalar_lea.hbm %s1021_s1, 128  ;;  %s1335_s26 = scalar_lea.hbm %s1722_s11, 512 }
 0x7b5   : > { %p1332_p3 = scmp.ne.s32.totalorder %s1021_s1, %s1331_s25  ;;  %p1336_p6 = scmp.lt.s32.totalorder %s1021_s1, %s1722_s11 }
 0x7b6   : > { %p1337_p8 = scmp.lt.s32.totalorder %s1335_s26, %s1331_s25 }
 0x7b7   : > { %p1333_p4 = pnand %p1332_p3, %p1496_p5 }
 0x7b8   : > { %p1338_p9 = por %p1337_p8, %p1336_p6 }
 0x7b9   : > { %p1334_p7 = pneg %p1333_p4 }
 0x7bb   : > { %p1339_p10 = pnand %p1338_p9, %p1334_p7 }
 0x7bd   : > { %1342 = shalt.err (!%p1339_p10)
}
 0x7be   : > { %1220 = dma.vmem_to_hbm [thread:$0]  (%p1496_p5), %s1024_s17, 128, %s1021_s1, %s1010_s0  }
 0x7bf PF: > { %p1232_p11 = scmp.ge.s32.totalorder %s1381_s24, 2  ;;  %s1041_s2 = sand.u32 1, %s1369_s21  }
 0x7c0   : > { %p1746_p12 = scmp.ne.s32.totalorder %s1734_s14, 0  ;;  %s1042_s3 = scalar_lea.sflag [#allocation5], %s1041_s2 }
 0x7c2   : > { %p1227_p13 = pnand %p1232_p11, %p1746_p12 }
 0x7c4   : > { %p1228_p0 = pneg %p1227_p13 }
 0x7c6   : > { %1364 = dma.done.wait (%p1228_p0), %s1042_s3, 128  }
 0x7c7   : > { %1366 = vsyncadd (%p1228_p0), %s1042_s3, 4294967168  ;;  %p24_p1 = scmp.ge.s32.totalorder %s1483_s27, 6   ;;  %s1747_s21 = smov %s1373_s22 }
 0x7c8   : > { %s1748_s22 = smov %s1377_s23  ;;  %s1749_s23 = smov %s1494_s30 }
 0x7c9   : > { %s1750_s24 = smov %s1483_s27  ;;  %26 = sbr.rel (!%p24_p1) target bundleno = 9 (0x9), region = 120 }
 0x7ce   :  { %1047 = vsyncpa [#allocation4], 1 }
 0x7cf   :  { %1049 = vsyncpa [#allocation4 + $0x1], 1 }
 0x7d0   :  { %1050 = vsyncpa [#allocation5], 1 }
 0x7d1   :  { %1052 = vsyncpa [#allocation5 + $0x1], 1 }

</bundles_post_ra>
